<compile_context>
chip_gen: v6e
topology: v6e:2x2x1
jax: 0.10.0
libtpu: 0.0.40
codegen_flags: <defaults>
</compile_context>

<pallas_src>
import jax
import jax.numpy as jnp
from jax.experimental import pallas as pl
from jax.experimental.pallas import tpu as pltpu


def _round_up(n, m):
    return ((n + m - 1) // m) * m


def _ceil_div(a, b):
    return -(-a // b)


def _policy_kernel(x_ref, w1_ref, b1_ref, w2_ref, b2_ref, o_ref):
    # fc1: bf16 operands on the MXU, f32 accumulation; bias-add + tanh in f32.
    x_bf16 = x_ref[...].astype(jnp.bfloat16)
    h = jnp.tanh(
        jnp.dot(x_bf16, w1_ref[...], preferred_element_type=jnp.float32)
        + b1_ref[...]
    )
    # fc2: cast activations to bf16 for the second MXU pass, accumulate f32.
    o_ref[...] = (
        jnp.dot(h.astype(jnp.bfloat16), w2_ref[...],
                preferred_element_type=jnp.float32)
        + b2_ref[...]
    ).astype(o_ref.dtype)


def deterministic_policy_forward(x, w1, b1, w2, b2, *, tb_max=2048):
    """Forward pass of DeterministicPolicy.

    x : [B, in_dim]           (f32 or bf16; output dtype follows x)
    w1: [in_dim, hidden_dim]  (PyTorch weight, already transposed)
    b1: [hidden_dim] or [1, hidden_dim]
    w2: [hidden_dim, out_dim]
    b2: [out_dim] or [1, out_dim]
    """
    B, in_dim = x.shape
    hidden_dim = w1.shape[1]
    out_dim = w2.shape[1]

    # Accept PyTorch-style 1-D biases; the kernel wants (1, N).
    b1 = jnp.reshape(b1, (1, hidden_dim)).astype(jnp.float32)
    b2 = jnp.reshape(b2, (1, out_dim)).astype(jnp.float32)
    w1_b = w1.astype(jnp.bfloat16)
    w2_b = w2.astype(jnp.bfloat16)

    # --- batch tiling -------------------------------------------------------
    # At least 2 grid steps (when the batch allows) so the 'parallel' axis can
    # be split across v7x's two TensorCores; tb divides b_pad so padded rows
    # (wasted DMA + compute) stay under 8.
    min_steps = 2 if B >= 16 else 1
    n_steps = max(_ceil_div(B, tb_max), min_steps)
    tb = _round_up(_ceil_div(B, n_steps), 8)
    b_pad = _round_up(B, tb)
    grid = (b_pad // tb,)

    x_p = x if b_pad == B else jnp.pad(x, ((0, b_pad - B), (0, 0)))

    out_itemsize = jnp.dtype(x.dtype).itemsize
    bytes_accessed = (
        x_p.size * x_p.dtype.itemsize
        + w1_b.size * 2 + w2_b.size * 2
        + b1.size * 4 + b2.size * 4
        + b_pad * out_dim * out_itemsize
    )
    cost = pl.CostEstimate(
        flops=2 * b_pad * (in_dim * hidden_dim + hidden_dim * out_dim),
        transcendentals=b_pad * hidden_dim,
        bytes_accessed=bytes_accessed,
    )

    out = pl.pallas_call(
        _policy_kernel,
        out_shape=jax.ShapeDtypeStruct((b_pad, out_dim), x.dtype),
        grid=grid,
        in_specs=[
            # x / out stream along the batch axis; weights & biases stay
            # VMEM-resident via constant index_maps (full-dim feature blocks).
            pl.BlockSpec((tb, in_dim), lambda i: (i, 0)),
            pl.BlockSpec((in_dim, hidden_dim), lambda i: (0, 0)),
            pl.BlockSpec((1, hidden_dim), lambda i: (0, 0)),
            pl.BlockSpec((hidden_dim, out_dim), lambda i: (0, 0)),
            pl.BlockSpec((1, out_dim), lambda i: (0, 0)),
        ],
        out_specs=pl.BlockSpec((tb, out_dim), lambda i: (i, 0)),
        compiler_params=pltpu.CompilerParams(
            dimension_semantics=("parallel",),
            vmem_limit_bytes=32 * 1024 * 1024,
        ),
        cost_estimate=cost,
    )(x_p, w1_b, b1, w2_b, b2)

    # Only the (small) batch padding is sliced away; skipped when exact fit.
    return out if b_pad == B else out[:B]


def init_params(key, input_dim, hidden_dim, output_dim):
    """Deterministic init mimicking nn.Linear's uniform(-1/sqrt(fan_in), ...)."""
    k1, k2, k3, k4 = jax.random.split(key, 4)
    lim1 = 1.0 / jnp.sqrt(input_dim)
    lim2 = 1.0 / jnp.sqrt(hidden_dim)
    # Stored already transposed relative to PyTorch: [in_features, out_features].
    w1 = jax.random.uniform(k1, (input_dim, hidden_dim), jnp.float32, -lim1, lim1)
    b1 = jax.random.uniform(k2, (1, hidden_dim), jnp.float32, -lim1, lim1)
    w2 = jax.random.uniform(k3, (hidden_dim, output_dim), jnp.float32, -lim2, lim2)
    b2 = jax.random.uniform(k4, (1, output_dim), jnp.float32, -lim2, lim2)
    return w1, b1, w2, b2


def _reference_checks(x, w1, b1, w2, b2, out):
    # Reference 1: same math as the kernel (bf16 MXU operands, f32 accumulation).
    h_ref = jnp.tanh(
        jnp.dot(x.astype(jnp.bfloat16), w1.astype(jnp.bfloat16),
                preferred_element_type=jnp.float32) + b1
    )
    ref_bf16 = jnp.dot(h_ref.astype(jnp.bfloat16), w2.astype(jnp.bfloat16),
                       preferred_element_type=jnp.float32) + b2
    assert jnp.allclose(out, ref_bf16, atol=1e-2, rtol=1e-2)
    # Reference 2: pure f32 PyTorch-equivalent forward (looser tol for bf16).
    ref_f32 = jnp.tanh(x @ w1 + b1) @ w2 + b2
    assert jnp.allclose(out, ref_f32, atol=5e-2, rtol=5e-2)


if __name__ == "__main__":
    key = jax.random.PRNGKey(0)
    kx, kp, kx2 = jax.random.split(key, 3)

    batch, input_dim, hidden_dim, output_dim = 8, 16, 32, 8
    x = jax.random.normal(kx, (batch, input_dim), jnp.float32)
    w1, b1, w2, b2 = init_params(kp, input_dim, hidden_dim, output_dim)

    fwd = jax.jit(deterministic_policy_forward)

    # Small batch: single grid step, exact fit (no pad, no slice).
    out = jax.block_until_ready(fwd(x, w1, b1, w2, b2))
    assert out.shape == (batch, output_dim)
    assert out.dtype == x.dtype
    _reference_checks(x, w1, b1, w2, b2, out)

    # Larger, non-tile-aligned batch: exercises multi-step grid + batch pad/slice.
    batch2 = 300
    x2 = jax.random.normal(kx2, (batch2, input_dim), jnp.float32)
    out2 = jax.block_until_ready(fwd(x2, w1, b1, w2, b2))
    assert out2.shape == (batch2, output_dim)
    _reference_checks(x2, w1, b1, w2, b2, out2)

    print("KERNEL_OK")
</pallas_src>

<mosaic_0001>
module attributes {stable_mosaic.version = 11 : i64} {
  func.func @_policy_kernel(%arg0: i32, %arg1: memref<8x16xf32, #tpu.memory_space<vmem>>, %arg2: memref<16x32xbf16, #tpu.memory_space<vmem>>, %arg3: memref<1x32xf32, #tpu.memory_space<vmem>>, %arg4: memref<32x8xbf16, #tpu.memory_space<vmem>>, %arg5: memref<1x8xf32, #tpu.memory_space<vmem>>, %arg6: memref<8x8xf32, #tpu.memory_space<vmem>>) attributes {dimension_semantics = [#tpu.dimension_semantics<parallel>], iteration_bounds = array<i64: 1>, scalar_prefetch = 0 : i64, scratch_operands = 0 : i64, tpu.core_type = #tpu.core_type<tc>, window_params = [{transform_indices = @transform_0, window_bounds = array<i64: 8, 16>}, {pipeline_mode = #tpu.pipeline_mode<synchronous>, transform_indices = @transform_1, window_bounds = array<i64: 16, 32>}, {pipeline_mode = #tpu.pipeline_mode<synchronous>, transform_indices = @transform_2, window_bounds = array<i64: 1, 32>}, {pipeline_mode = #tpu.pipeline_mode<synchronous>, transform_indices = @transform_3, window_bounds = array<i64: 32, 8>}, {pipeline_mode = #tpu.pipeline_mode<synchronous>, transform_indices = @transform_4, window_bounds = array<i64: 1, 8>}, {transform_indices = @transform_5, window_bounds = array<i64: 8, 8>}]} {
    %c0 = arith.constant 0 : index
    %c0_0 = arith.constant 0 : index
    %0 = vector.load %arg1[%c0, %c0_0] : memref<8x16xf32, #tpu.memory_space<vmem>>, vector<8x16xf32>
    %1 = arith.truncf %0 : vector<8x16xf32> to vector<8x16xbf16>
    %c0_1 = arith.constant 0 : index
    %c0_2 = arith.constant 0 : index
    %2 = vector.load %arg2[%c0_1, %c0_2] : memref<16x32xbf16, #tpu.memory_space<vmem>>, vector<16x32xbf16>
    %cst = arith.constant dense<0.000000e+00> : vector<8x32xf32>
    %3 = tpu.matmul %1, %2, %cst {dimension_numbers = #tpu.dot_dimension_numbers<[1], [0], [0], [1], [0, 0, 1, 1], [], []>} : vector<8x16xbf16>, vector<16x32xbf16>, vector<8x32xf32> -> vector<8x32xf32>
    %c0_3 = arith.constant 0 : index
    %c0_4 = arith.constant 0 : index
    %4 = vector.load %arg3[%c0_3, %c0_4] : memref<1x32xf32, #tpu.memory_space<vmem>>, vector<1x32xf32>
    %5 = vector.broadcast %4 : vector<1x32xf32> to vector<8x32xf32>
    %6 = arith.addf %3, %5 : vector<8x32xf32>
    %7 = math.tanh %6 : vector<8x32xf32>
    %8 = arith.truncf %7 : vector<8x32xf32> to vector<8x32xbf16>
    %c0_5 = arith.constant 0 : index
    %c0_6 = arith.constant 0 : index
    %9 = vector.load %arg4[%c0_5, %c0_6] : memref<32x8xbf16, #tpu.memory_space<vmem>>, vector<32x8xbf16>
    %cst_7 = arith.constant dense<0.000000e+00> : vector<8x8xf32>
    %10 = tpu.matmul %8, %9, %cst_7 {dimension_numbers = #tpu.dot_dimension_numbers<[1], [0], [0], [1], [0, 0, 1, 1], [], []>} : vector<8x32xbf16>, vector<32x8xbf16>, vector<8x8xf32> -> vector<8x8xf32>
    %c0_8 = arith.constant 0 : index
    %c0_9 = arith.constant 0 : index
    %11 = vector.load %arg5[%c0_8, %c0_9] : memref<1x8xf32, #tpu.memory_space<vmem>>, vector<1x8xf32>
    %12 = vector.broadcast %11 : vector<1x8xf32> to vector<8x8xf32>
    %13 = arith.addf %10, %12 : vector<8x8xf32>
    %c0_10 = arith.constant 0 : index
    %c0_11 = arith.constant 0 : index
    %14 = vector.load %arg6[%c0_10, %c0_11] : memref<8x8xf32, #tpu.memory_space<vmem>>, vector<8x8xf32>
    tpu.vector_store %arg6[%c0_10, %c0_11], %13 {strides = array<i32>} : memref<8x8xf32, #tpu.memory_space<vmem>>, vector<8x8xf32>,
    return
  }
  func.func @transform_0(%arg0: i32) -> (i32, i32) {
    %c0_i32 = arith.constant 0 : i32
    %c0_i32_0 = arith.constant 0 : i32
    return %arg0, %c0_i32 : i32, i32
  }
  func.func @transform_1(%arg0: i32) -> (i32, i32) {
    %c0_i32 = arith.constant 0 : i32
    %c0_i32_0 = arith.constant 0 : i32
    %c0_i32_1 = arith.constant 0 : i32
    return %c0_i32, %c0_i32_0 : i32, i32
  }
  func.func @transform_2(%arg0: i32) -> (i32, i32) {
    %c0_i32 = arith.constant 0 : i32
    %c0_i32_0 = arith.constant 0 : i32
    %c0_i32_1 = arith.constant 0 : i32
    return %c0_i32, %c0_i32_0 : i32, i32
  }
  func.func @transform_3(%arg0: i32) -> (i32, i32) {
    %c0_i32 = arith.constant 0 : i32
    %c0_i32_0 = arith.constant 0 : i32
    %c0_i32_1 = arith.constant 0 : i32
    return %c0_i32, %c0_i32_0 : i32, i32
  }
  func.func @transform_4(%arg0: i32) -> (i32, i32) {
    %c0_i32 = arith.constant 0 : i32
    %c0_i32_0 = arith.constant 0 : i32
    %c0_i32_1 = arith.constant 0 : i32
    return %c0_i32, %c0_i32_0 : i32, i32
  }
  func.func @transform_5(%arg0: i32) -> (i32, i32) {
    %c0_i32 = arith.constant 0 : i32
    %c0_i32_0 = arith.constant 0 : i32
    return %arg0, %c0_i32 : i32, i32
  }
}

</mosaic_0001>

<bundles_post_ra>
// kernel: deterministic_policy_forward.1
= control target key start
LH: loop header
LB: loop body
LE: loop exit
PB: predicated region body
PF: predicated region fallthrough
CT: control target
= control target key end

     0   :  { %v224_v1 = vmov 0.0   ;;  %vm39_vm0 = vcmask 130048   ;;  %vm225_vm1 = vmmov 0   ;;  %s278_s0 = inlined_call_operand.vmem [shape: f32[8,16], index: 0, kind: input, shape index: {}]   ;;  %s279_s1 = inlined_call_operand.vmem [shape: bf16[16,32], index: 1, kind: input, shape index: {}]   ;;  %s280_s2 = inlined_call_operand.vmem [shape: f32[1,32], index: 2, kind: input, shape index: {}]   ;;  %s281_s3 = inlined_call_operand.vmem [shape: bf16[32,8], index: 3, kind: input, shape index: {}]   ;;  %s282_s4 = inlined_call_operand.vmem [shape: f32[1,8], index: 4, kind: input, shape index: {}]   ;;  %s283_s5 = inlined_call_operand.hbm [shape: f32[8,8], index: 5, kind: output, shape index: {}]  }
   0x1   :  { %v197_v0 = vld [vmem:[%s279_s1] sm:$0xff]   ;;  %180 = vmatprep.subr.bf16.mxu0 %v224_v1  ;;  %186 = vmatprep.subr.bf16.mxu1 %v224_v1 }
   0x2   :  { %v22_v2 = vld [vmem:[%s278_s0] sm:$0xff]  ;;  %181 = vmatpush3.bf16.msra.mxu0 %v197_v0  ;;  %182 = vmatprep.mubr.msk.bf16.mxu0 %vm225_vm1, %v224_v1 }
   0x3   :  { %v23_v3 = vpack.c.bf16 %v22_v2, %v22_v2  ;;  %190 = vmatprep.mubr.msk.bf16.mxu1 %vm225_vm1, %v224_v1 }
   0x4   :  { %10 = vsyncpa [#allocation3], 0  ;;  %v198_v4 = vld [vmem:[%s281_s3 + $0x8] sm:$0xff]   ;;  %v199_v5 = vld [vmem:[%s281_s3] sm:$0xff]   ;;  %vm108_vm2 = vcmask 261120   ;;  %s226_s3 = smov [#allocation2]  }
   0x5   :  { %183 = vmatmul.mubr.msk.bf16.vlgmr.msra.gmra.mxu0 %vm39_vm0, %v23_v3  ;;  %187 = vmatpush3.bf16.msra.mxu1 %v198_v4  ;;  %v168_v6 = vld [vmem:[%s280_s2] ss:$0 sm:$0xff]  ;;  %s160_s28 = sshll.u32 %s226_s3, 4  ;;  %vm152_vm3 = vcmask 64512   ;;  %s161_s28 = int_to_ptr.vmem [resolvable:$true] %s160_s28 }
   0x6   :  { %188 = vmatprep.subr.bf16.mxu1 %v224_v1  ;;  %v171_v14 = vld [vmem:[%s282_s4] ss:$0 sm:$0xff]  ;;  %s202_s2 = scalar_lea.vmem %s161_s28, 128  ;;  %p207_p1 = scmp.lt.s32.totalorder %s161_s28, %s161_s28 }
   0x7   :  { %p203_p0 = scmp.ne.s32.totalorder %s161_s28, %s202_s2  ;;  %p208_p2 = scmp.lt.s32.totalorder %s202_s2, %s202_s2 }
   0x9   :  { %189 = vmatpush3.bf16.msra.mxu1 %v199_v5  ;;  %p209_p3 = por %p208_p2, %p207_p1 }
   0xb   :  { %p210_p4 = pnand %p209_p3, %p203_p0 }
  0xc5   :  { %v77_v7 = vpop.f32.mrf.mxu0 }
  0xc6   :  { %v78_v8 = vadd.f32 %v168_v6, %v77_v7 }
  0xc7   :  { %v184_v9 = vpop.f32.mrf.mxu0 }
  0xc8   :  { %200 = vtanh.f32 %v78_v8 }
  0xc9   :  { %v80_v10 = vpop.f32.mrf.mxu0 }
  0xcb   :  { %v185_v11 = vpop.f32.mrf.mxu0 }
  0xd5   :  { %v201_v12 = vpop.eup %200 }
  0xd6   :  { %v84_v13 = vpack.c.bf16 %v201_v12, %v201_v12 }
  0xd8   :  { %191 = vmatmul.mubr.msk.bf16.vlgmr.msra.gmra.mxu1 %vm108_vm2, %v84_v13 }
 0x198   :  { %v146_v15 = vpop.f32.mrf.mxu1 }
 0x199   :  { %v147_v16 = vadd.f32 %v171_v14, %v146_v15 }
 0x19a   :  { %v192_v17 = vpop.f32.mrf.mxu1 }
 0x19b   :  { %153 = vst.msk [vmem:[#allocation2] sm:$0xff] %vm152_vm3, %v147_v16 }
 0x19c   :  { %v149_v18 = vpop.f32.mrf.mxu1 }
 0x19d   :  { %213 = shalt.err (!%p210_p4)
}
 0x19e   :  { %163 = dma.vmem_to_hbm [thread:$0]  %s161_s28, 128, %s283_s5, [#allocation3]   ;;  %v193_v19 = vpop.f32.mrf.mxu1 }
 0x19f   :  { %222 = dma.done.wait [#allocation3], 128  }
 0x1a0   :  { %223 = vsyncadd [#allocation3], 4294967168 }
 0x1a1   :  { %167 = vsyncpa [#allocation3], 1 }

</bundles_post_ra>
